<compile_context>
chip_gen: v5e
topology: v5e:2x2
jax: 0.10.0
libtpu: 0.0.40
codegen_flags: <defaults>
</compile_context>

<pallas_src>
import math

import jax
import jax.numpy as jnp
from jax.experimental import pallas as pl
from jax.experimental.pallas import tpu as pltpu

_SUBLANES = 8
_LANES = 128
_TARGET_BLOCK_BYTES = 4 << 20     # ~4 MiB of f32 per input block per grid step


def _pack_geometry(n, target_block_bytes=_TARGET_BLOCK_BYTES, min_row_blocks=2):
    """Pick a lane-dense (rows, lanes) packing and a row tile for n elements.

    Prefers a packing that needs no padding (n % 1024 == 0 -> pure reshape).
    """
    lanes = _LANES
    if n % (lanes * _SUBLANES) == 0:
        rows = n // lanes                                   # no padding needed
    else:
        rows = -(-n // lanes)
        rows = -(-rows // _SUBLANES) * _SUBLANES            # padded fallback

    # Row tile sized for ~target_block_bytes of f32 per block.
    tr = (target_block_bytes // (lanes * 4)) // _SUBLANES * _SUBLANES
    # Keep at least `min_row_blocks` grid steps on the row axis when possible
    # (feeds the second TensorCore on v7x, enables DMA/compute pipelining).
    if rows >= min_row_blocks * _SUBLANES:
        tr = min(tr, (rows // min_row_blocks) // _SUBLANES * _SUBLANES)
    tr = max(_SUBLANES, min(tr, rows))
    # Make the grid divide evenly (rows is always a multiple of 8, so tr=8 works).
    while rows % tr:
        tr -= _SUBLANES
    return rows, lanes, tr


def _pack_2d(x, rows, lanes):
    """Flatten x into a (rows, lanes) slab; zero-pad only if unavoidable."""
    flat = x.reshape(-1)
    total = rows * lanes
    if total != flat.shape[0]:
        flat = jnp.pad(flat, (0, total - flat.shape[0]))
    return flat.reshape(rows, lanes)


def _vmem_limit(block_bytes):
    # ~5-7 live blocks (double-buffered in/out + state scratch) + headroom,
    # capped so we never flirt with v7x's 64 MiB physical VMEM.
    return int(min(48 << 20, max(32 << 20, 7 * block_bytes)))


# ----------------------------- single timestep ------------------------------

def _step_kernel(c0, inv_tau):
    def kernel(s_ref, i_ref, o_ref):
        s = s_ref[...].astype(jnp.float32)
        i_prev = i_ref[...].astype(jnp.float32)
        o_ref[...] = (i_prev * (c0 + inv_tau * s) + s).astype(o_ref.dtype)
    return kernel


def synapse_filter_step(in_spikes, i_prev, tau=100.0,
                        target_block_bytes=_TARGET_BLOCK_BYTES):
    """One SynapseFilter timestep (== module.forward).

    Returns the new output current I(t), which is also the new state.
    `i_prev` may be a scalar (state after reset()) or an array of the same shape.
    """
    shape = in_spikes.shape
    n = in_spikes.size
    inv_tau = float(1.0 / tau)
    c0 = float(1.0 - inv_tau)

    i_prev = jnp.broadcast_to(jnp.asarray(i_prev, dtype=jnp.float32), shape)

    rows, lanes, tr = _pack_geometry(n, target_block_bytes)
    s2d = _pack_2d(in_spikes.astype(jnp.float32), rows, lanes)
    i2d = _pack_2d(i_prev, rows, lanes)
    block_bytes = tr * lanes * 4

    grid_spec = pltpu.PrefetchScalarGridSpec(
        num_scalar_prefetch=0,
        grid=(rows // tr,),
        in_specs=[
            pl.BlockSpec((tr, lanes), lambda r: (r, 0)),
            pl.BlockSpec((tr, lanes), lambda r: (r, 0)),
        ],
        out_specs=pl.BlockSpec((tr, lanes), lambda r: (r, 0)),
    )

    out2d = pl.pallas_call(
        _step_kernel(c0, inv_tau),
        out_shape=jax.ShapeDtypeStruct((rows, lanes), jnp.float32),
        grid_spec=grid_spec,
        compiler_params=pltpu.CompilerParams(
            dimension_semantics=("parallel",),
            vmem_limit_bytes=_vmem_limit(block_bytes)),
        input_output_aliases={1: 0},      # state updated in place
    )(s2d, i2d)

    if rows * lanes != n:
        return out2d.reshape(-1)[:n].reshape(shape)
    return out2d.reshape(shape)


# --------------------------- fused T timesteps -------------------------------

def _scan_kernel(c0, inv_tau):
    def kernel(init_ref, s_ref, o_ref, state):
        t = pl.program_id(1)

        @pl.when(t == 0)
        def _():
            state[...] = jnp.full(state.shape, init_ref[0], state.dtype)

        s = s_ref[0].astype(jnp.float32)          # (tr, lanes)
        i_new = state[...] * (c0 + inv_tau * s) + s
        state[...] = i_new
        o_ref[0] = i_new.astype(o_ref.dtype)
    return kernel


def synapse_filter_scan(in_spikes, i0=0.0, tau=100.0,
                        target_block_bytes=_TARGET_BLOCK_BYTES):
    """Run T fused timesteps.  in_spikes: [T, ...], i0: scalar initial state.

    Returns (outputs [T, ...], final state [...]).  The state stays resident
    in VMEM across the (innermost, sequential) time axis of the grid; per step
    the only HBM traffic is spikes in / current out.
    """
    num_t = in_spikes.shape[0]
    shape = in_spikes.shape[1:]
    n = math.prod(shape)
    inv_tau = float(1.0 / tau)
    c0 = float(1.0 - inv_tau)

    rows, lanes, tr = _pack_geometry(n, target_block_bytes)
    total = rows * lanes
    block_bytes = tr * lanes * 4

    s_flat = in_spikes.astype(jnp.float32).reshape(num_t, n)
    if total != n:
        # TODO(synk): tail-block-only padding to avoid this full copy on awkward sizes.
        s_flat = jnp.pad(s_flat, ((0, 0), (0, total - n)))
    s3d = s_flat.reshape(num_t, rows, lanes)

    init = jnp.full((1,), i0, dtype=jnp.float32)   # scalar initial state -> SMEM

    grid_spec = pltpu.PrefetchScalarGridSpec(
        num_scalar_prefetch=0,
        grid=(rows // tr, num_t),                  # time last => innermost, sequential
        in_specs=[
            pl.BlockSpec(memory_space=pltpu.MemorySpace.SMEM),
            pl.BlockSpec((1, tr, lanes), lambda r, t: (t, r, 0)),
        ],
        out_specs=pl.BlockSpec((1, tr, lanes), lambda r, t: (t, r, 0)),
        scratch_shapes=[pltpu.VMEM((tr, lanes), jnp.float32)],
    )

    out3d = pl.pallas_call(
        _scan_kernel(c0, inv_tau),
        out_shape=jax.ShapeDtypeStruct((num_t, rows, lanes), jnp.float32),
        grid_spec=grid_spec,
        compiler_params=pltpu.CompilerParams(
            dimension_semantics=("parallel", "arbitrary"),
            vmem_limit_bytes=_vmem_limit(block_bytes)),
    )(init, s3d)

    if total != n:
        out = out3d.reshape(num_t, total)[:, :n].reshape((num_t,) + shape)
    else:
        out = out3d.reshape((num_t,) + shape)
    i_last = out[num_t - 1]                        # final state == last output
    return out, i_last


# ------------------------------- reference -----------------------------------

def synapse_filter_reference(in_spikes, i0, tau=100.0):
    """Pure-JAX reference matching the PyTorch module applied over T steps."""
    inv_tau = 1.0 / tau

    def step(i_prev, s):
        i_new = i_prev - (1.0 - s) * i_prev * inv_tau + s
        return i_new, i_new

    i0 = jnp.broadcast_to(jnp.asarray(i0, dtype=jnp.float32), in_spikes.shape[1:])
    i_last, outs = jax.lax.scan(step, i0, in_spikes)
    return outs, i_last


if __name__ == "__main__":
    T, B, C, H, W = 8, 2, 4, 16, 16
    tau = 10.0
    key = jax.random.PRNGKey(0)

    # Binary spikes like an SNN would emit (values in {0, 1}).
    in_spikes = (jax.random.uniform(key, (T, B, C, H, W)) >= 0.8).astype(jnp.float32)

    # Path 1: per-timestep kernel (module.forward semantics), state kept
    # on-device across calls and the whole T-step loop jitted (one dispatch).
    @jax.jit
    def run_steps(spk):
        i0 = jnp.zeros(spk.shape[1:], jnp.float32)      # state after reset()

        def body(i_prev, s):
            i_new = synapse_filter_step(s, i_prev, tau=tau)
            return i_new, i_new

        i_last, outs = jax.lax.scan(body, i0, spk)
        return outs, i_last

    step_outs, step_last = run_steps(in_spikes)

    # Path 2: fused T-timestep kernel with the state resident in VMEM.
    scan_outs, scan_last = synapse_filter_scan(in_spikes, 0.0, tau=tau)

    jax.block_until_ready((step_outs, step_last, scan_outs, scan_last))

    # Correctness checks vs pure-JAX reference (algebraic refactor may differ
    # from the textbook formula by <= 1 ulp).
    ref_outs, ref_last = synapse_filter_reference(in_spikes, 0.0, tau=tau)
    assert jnp.allclose(step_outs, ref_outs, atol=1e-5), "per-step kernel mismatch"
    assert jnp.allclose(step_last, ref_last, atol=1e-5), "per-step final state mismatch"
    assert jnp.allclose(scan_outs, ref_outs, atol=1e-5), "fused-scan kernel mismatch"
    assert jnp.allclose(scan_last, ref_last, atol=1e-5), "fused-scan final state mismatch"

    print("KERNEL_OK")
</pallas_src>

<mosaic_0001>
module attributes {stable_mosaic.version = 11 : i64} {
  func.func @kernel(%arg0: i32, %arg1: memref<8x128xf32, #tpu.memory_space<vmem>>, %arg2: memref<8x128xf32, #tpu.memory_space<vmem>>, %arg3: memref<8x128xf32, #tpu.memory_space<vmem>>) attributes {dimension_semantics = [#tpu.dimension_semantics<parallel>], iteration_bounds = array<i64: 2>, scalar_prefetch = 0 : i64, scratch_operands = 0 : i64, tpu.core_type = #tpu.core_type<tc>, window_params = [{transform_indices = @transform_0, window_bounds = array<i64: 8, 128>}, {transform_indices = @transform_1, window_bounds = array<i64: 8, 128>}, {transform_indices = @transform_2, window_bounds = array<i64: 8, 128>}]} {
    %c0 = arith.constant 0 : index
    %c0_0 = arith.constant 0 : index
    %0 = vector.load %arg1[%c0, %c0_0] : memref<8x128xf32, #tpu.memory_space<vmem>>, vector<8x128xf32>
    %c0_1 = arith.constant 0 : index
    %c0_2 = arith.constant 0 : index
    %1 = vector.load %arg2[%c0_1, %c0_2] : memref<8x128xf32, #tpu.memory_space<vmem>>, vector<8x128xf32>
    %cst = arith.constant 1.000000e-01 : f32
    %2 = vector.broadcast %cst : f32 to vector<8x128xf32>
    %3 = arith.mulf %2, %0 : vector<8x128xf32>
    %cst_3 = arith.constant 0.899999976 : f32
    %4 = vector.broadcast %cst_3 : f32 to vector<8x128xf32>
    %5 = arith.addf %4, %3 : vector<8x128xf32>
    %6 = arith.mulf %1, %5 : vector<8x128xf32>
    %7 = arith.addf %6, %0 : vector<8x128xf32>
    %c0_4 = arith.constant 0 : index
    %c0_5 = arith.constant 0 : index
    %8 = vector.load %arg3[%c0_4, %c0_5] : memref<8x128xf32, #tpu.memory_space<vmem>>, vector<8x128xf32>
    tpu.vector_store %arg3[%c0_4, %c0_5], %7 {strides = array<i32>} : memref<8x128xf32, #tpu.memory_space<vmem>>, vector<8x128xf32>,
    return
  }
  func.func @transform_0(%arg0: i32) -> (i32, i32) {
    %c0_i32 = arith.constant 0 : i32
    %c0_i32_0 = arith.constant 0 : i32
    return %arg0, %c0_i32 : i32, i32
  }
  func.func @transform_1(%arg0: i32) -> (i32, i32) {
    %c0_i32 = arith.constant 0 : i32
    %c0_i32_0 = arith.constant 0 : i32
    return %arg0, %c0_i32 : i32, i32
  }
  func.func @transform_2(%arg0: i32) -> (i32, i32) {
    %c0_i32 = arith.constant 0 : i32
    %c0_i32_0 = arith.constant 0 : i32
    return %arg0, %c0_i32 : i32, i32
  }
}

</mosaic_0001>

<bundles_post_ra>
// kernel: custom-call
= control target key start
LH: loop header
LB: loop body
LE: loop exit
PB: predicated region body
PF: predicated region fallthrough
CT: control target
= control target key end

     0   :  { %s6_s0 = inlined_call_operand.hbm [shape: f32[8,2,4,16,16], index: 0, kind: output, shape index: {}]  }

// kernel: closed_call.6
= control target key start
LH: loop header
LB: loop body
LE: loop exit
PB: predicated region body
PF: predicated region fallthrough
CT: control target
= control target key end

     0   :  { %s250_s9 = smov 0   ;;  %s278_s0 = inlined_call_operand.vmem [shape: f32[16,128], index: 0, kind: input, shape index: {}]   ;;  %s279_s1 = inlined_call_operand.vmem [shape: f32[16,128], index: 1, kind: input, shape index: {}, may-alias: {1,2}]   ;;  %s280_s2 = inlined_call_operand.vmem [shape: f32[16,128], index: 2, kind: output, shape index: {}, may-alias: {1,2}]  }
   0x1 LB: > { %s228_s10 = sadd.s32 4294967295, %s252_s9   ;;  %p232_p0 = scmp.ge.s32.totalorder %s252_s9, 1  ;;  %s252_s9 = sphi %s250_s9, %s12_s9  }
   0x2   : > { %p120_p1 = scmp.lt.s32.totalorder %s252_s9, 3 }
   0x4   : > { %p121_p2 = pnand %p232_p0, %p120_p1 }
   0x5   : > { %p144_p3 = scmp.lt.s32.totalorder (!%p121_p2), %s228_s10, 1 }
   0x6   : > { %124 = sbr.rel (%p121_p2) target bundleno = 24 (0x18), region = 28 }
   0xb   : > { %s282_s10 = smov (!%p144_p3, %s228_s10), 1 }
   0xc   : > { %s233_s11 = sshll.u32 %s282_s10, 3 }
   0xd   : > { %s147_s14 = scalar_lea.vmem %s278_s0, %s233_s11  ;;  %s151_s17 = scalar_lea.vmem %s279_s1, %s233_s11 }
   0xe   : > { %v156_v0 = vld [vmem:[%s147_s14] sm:$0xff]  ;;  %s155_s20 = scalar_lea.vmem %s280_s2, %s233_s11 }
   0xf   : > { %v158_v1 = vmul.f32 0.1, %v156_v0  ;;  %v157_v2 = vld [vmem:[%s151_s17] sm:$0xff] }
  0x11   : > { %v159_v3 = vadd.f32 0.9, %v158_v1 }
  0x13   : > { %v160_v4 = vmul.f32 %v159_v3, %v157_v2 }
  0x15   : > { %v161_v5 = vadd.f32 %v160_v4, %v156_v0 }
  0x17   : > { %162 = vst [vmem:[%s155_s20] sm:$0xff] %v161_v5 }
  0x18 PF: > { %s12_s9 = sadd.s32 1, %s252_s9  }
  0x19   : > { %p9_p4 = scmp.ge.s32.totalorder %s12_s9, 4  }
  0x1b   :  { %11 = sbr.rel (!%p9_p4) target bundleno = 1 (0x1), region = 61 }

</bundles_post_ra>
